<compile_context>
chip_gen: v6e
topology: v6e:2x2x1
jax: 0.10.0
libtpu: 0.0.40
codegen_flags: <defaults>
</compile_context>

<pallas_src>
import jax
import jax.numpy as jnp
from jax.experimental import pallas as pl
from jax.experimental.pallas import tpu as pltpu


def _round_up(x, m):
    return ((x + m - 1) // m) * m


def _camera_init_loss_kernel(slab_ref, cam_ref, out_ref):
    """One batch tile of TB lanes per grid step (sublane = joint, lane = batch).

    slab_ref : VMEM f32[5, Jsel, TB]  planes: x, y, z, gt_u, gt_v
    cam_ref  : VMEM f32[18, TB]       rows: R00..R22, tx,ty,tz, fx,fy, cx,cy,
                                      depth_loss_weight*(tz - trans_est_z),
                                      data_weight**2 * valid
    out_ref  : VMEM f32[1, TB]        per-batch-column loss (summed in wrapper)
    """
    x = slab_ref[0]                       # (Jsel, TB)
    y = slab_ref[1]
    z = slab_ref[2]
    gu = slab_ref[3]
    gv = slab_ref[4]

    def row(k):                           # (1, TB) — broadcast over sublanes (cheap)
        return cam_ref[k:k + 1, :]

    # p_cam = R @ p + t
    px = row(0) * x + row(1) * y + row(2) * z + row(9)
    py = row(3) * x + row(4) * y + row(5) * z + row(10)
    pz = row(6) * x + row(7) * y + row(8) * z + row(11)

    # 1/z on the EUP slot, one Newton step for full f32 accuracy.
    inv_z = pl.reciprocal(pz, approx=True)
    inv_z = inv_z * (2.0 - pz * inv_z)

    u = px * inv_z * row(12) + row(14)    # fx * x/z + cx
    v = py * inv_z * row(13) + row(15)    # fy * y/z + cy

    du = gu - u
    dv = gv - v
    # Sublane reduce over the selected joints -> (1, TB).
    joint_loss = jnp.sum(du * du + dv * dv, axis=0, keepdims=True)

    dterm = row(16)                       # depth_loss_weight * (tz - trans_est_z)
    # row(17) = data_weight**2 on valid columns, 0 on padded columns.
    out_ref[...] = joint_loss * row(17) + dterm * dterm


def smplify_camera_init_loss(joints, rotation, translation, focal, center,
                             gt_joints_2d, init_joints_idxs, trans_estimation,
                             data_weight=1.0, depth_loss_weight=100.0):
    """JAX wrapper. joints: [B,J,3], gt_joints_2d: [B,J,2]. Returns scalar loss."""
    B, J, _ = joints.shape
    f32 = jnp.float32

    # index_select semantics: gather selected joints up front (duplicates kept).
    sel = jnp.asarray(init_joints_idxs, jnp.int32)
    Jsel = int(sel.shape[0])
    j_sel = joints[:, sel, :].astype(f32)            # (B, Jsel, 3)
    g_sel = gt_joints_2d[:, sel, :].astype(f32)      # (B, Jsel, 2)

    # Batch tiling: batch on the LANE axis -> TB must be a multiple of 128.
    if B <= 256:
        TB = _round_up(B, 128)                       # single tile, no grid overhead
    else:
        TB = min(4096, _round_up((B + 1) // 2, 128))  # >=2 tiles (v7x megacore)
    B_pad = _round_up(B, TB)
    grid = B_pad // TB
    pad = B_pad - B

    # Single slab [coord, Jsel, B]: one DMA per tile, lane-dense rows.
    slab = jnp.concatenate(
        [jnp.transpose(j_sel, (2, 1, 0)),            # (3, Jsel, B)
         jnp.transpose(g_sel, (2, 1, 0))], axis=0)   # (5, Jsel, B)
    if pad:
        slab = jnp.pad(slab, ((0, 0), (0, 0), (0, pad)))

    dw2 = jnp.asarray(data_weight, f32) ** 2
    dlw = jnp.asarray(depth_loss_weight, f32)
    if trans_estimation is not None:
        dterm = (translation[:, 2] - trans_estimation[:, 2]).astype(f32) \
            * jnp.where(dlw > 0, dlw, jnp.zeros((), f32))
    else:
        dterm = jnp.zeros((B,), f32)

    cam = jnp.concatenate([
        rotation.reshape(B, 9).astype(f32).T,        # rows 0..8   : R00..R22
        translation.reshape(B, 3).astype(f32).T,     # rows 9..11  : tx,ty,tz
        focal.reshape(B, 2).astype(f32).T,           # rows 12..13 : fx,fy
        center.reshape(B, 2).astype(f32).T,          # rows 14..15 : cx,cy
        dterm[None, :],                              # row 16      : depth residual
        jnp.broadcast_to(dw2, (1, B)),               # row 17      : dw^2 * valid
    ], axis=0)                                       # (18, B)
    if pad:
        # Padded columns: zeros everywhere except tz (row 11) = 1 (avoid 1/0);
        # row 17 mask = 0 and row 16 depth residual = 0 keep them out of the loss.
        pad_cols = jnp.zeros((18, pad), f32).at[11, :].set(1.0)
        cam = jnp.concatenate([cam, pad_cols], axis=1)

    out = pl.pallas_call(
        _camera_init_loss_kernel,
        out_shape=jax.ShapeDtypeStruct((1, B_pad), f32),
        grid_spec=pltpu.PrefetchScalarGridSpec(
            num_scalar_prefetch=0,
            grid=(grid,),
            in_specs=[
                pl.BlockSpec((5, Jsel, TB), lambda t: (0, 0, t)),  # joints + gt slab
                pl.BlockSpec((18, TB), lambda t: (0, t)),          # camera table
            ],
            out_specs=pl.BlockSpec((1, TB), lambda t: (0, t)),
        ),
        compiler_params=pltpu.CompilerParams(
            dimension_semantics=("parallel",)),                    # independent tiles
    )(slab, cam)

    return jnp.sum(out)


def _reference(joints, rotation, translation, focal, center,
               gt_joints_2d, idxs, trans_estimation, data_weight, depth_loss_weight):
    """Pure-JAX reference mirroring the PyTorch forward."""
    p_cam = jnp.einsum('bij,bnj->bni', rotation, joints) + translation[:, None, :]
    img = p_cam[..., :2] / p_cam[..., 2:3]
    proj = img * focal[:, None, :] + center[:, None, :]
    d = gt_joints_2d[:, idxs, :] - proj[:, idxs, :]
    joint_loss = jnp.sum(d ** 2) * data_weight ** 2
    depth_loss = depth_loss_weight ** 2 * jnp.sum(
        (translation[:, 2] - trans_estimation[:, 2]) ** 2)
    return joint_loss + depth_loss


if __name__ == "__main__":
    B, J = 2, 24
    key = jax.random.PRNGKey(0)
    k1, k2, k3, k4 = jax.random.split(key, 4)

    joints = jax.random.normal(k1, (B, J, 3), jnp.float32) * 0.5          # body joints
    rotation = jnp.tile(jnp.eye(3, dtype=jnp.float32)[None], (B, 1, 1))   # camera R
    translation = (jnp.tile(jnp.array([0.0, 0.0, 10.0], jnp.float32)[None], (B, 1))
                   + 0.1 * jax.random.normal(k2, (B, 3), jnp.float32))    # camera t
    focal = jnp.full((B, 2), 500.0, jnp.float32)
    center = jnp.full((B, 2), 128.0, jnp.float32)
    gt_joints_2d = center[:, None, :] + 50.0 * jax.random.normal(k3, (B, J, 2), jnp.float32)
    init_joints_idxs = jnp.array([0, 2, 5, 8, 11], jnp.int32)             # buffer
    trans_estimation = translation + 0.1 * jax.random.normal(k4, (B, 3), jnp.float32)

    data_weight = 1.0            # registered buffer in __init__
    depth_loss_weight = 100.0    # registered buffer in __init__

    loss = smplify_camera_init_loss(
        joints, rotation, translation, focal, center,
        gt_joints_2d, init_joints_idxs, trans_estimation,
        data_weight=data_weight, depth_loss_weight=depth_loss_weight)
    loss = jax.block_until_ready(loss)

    ref = _reference(joints, rotation, translation, focal, center,
                     gt_joints_2d, init_joints_idxs, trans_estimation,
                     data_weight, depth_loss_weight)
    assert jnp.allclose(loss, ref, rtol=1e-4, atol=1e-3), (loss, ref)

    print("KERNEL_OK")
</pallas_src>

<mosaic_0001>
module attributes {stable_mosaic.version = 11 : i64} {
  func.func @_camera_init_loss_kernel(%arg0: i32, %arg1: memref<5x5x128xf32, #tpu.memory_space<vmem>>, %arg2: memref<18x128xf32, #tpu.memory_space<vmem>>, %arg3: memref<1x128xf32, #tpu.memory_space<vmem>>) attributes {dimension_semantics = [#tpu.dimension_semantics<parallel>], iteration_bounds = array<i64: 1>, scalar_prefetch = 0 : i64, scratch_operands = 0 : i64, tpu.core_type = #tpu.core_type<tc>, window_params = [{transform_indices = @transform_0, window_bounds = array<i64: 5, 5, 128>}, {transform_indices = @transform_1, window_bounds = array<i64: 18, 128>}, {transform_indices = @transform_2, window_bounds = array<i64: 1, 128>}]} {
    %c0 = arith.constant 0 : index
    %c0_0 = arith.constant 0 : index
    %c0_1 = arith.constant 0 : index
    %0 = vector.load %arg1[%c0, %c0_0, %c0_1] : memref<5x5x128xf32, #tpu.memory_space<vmem>>, vector<1x5x128xf32>
    %1 = vector.shape_cast %0 : vector<1x5x128xf32> to vector<5x128xf32>
    %c1 = arith.constant 1 : index
    %c0_2 = arith.constant 0 : index
    %c0_3 = arith.constant 0 : index
    %2 = vector.load %arg1[%c1, %c0_2, %c0_3] : memref<5x5x128xf32, #tpu.memory_space<vmem>>, vector<1x5x128xf32>
    %3 = vector.shape_cast %2 : vector<1x5x128xf32> to vector<5x128xf32>
    %c2 = arith.constant 2 : index
    %c0_4 = arith.constant 0 : index
    %c0_5 = arith.constant 0 : index
    %4 = vector.load %arg1[%c2, %c0_4, %c0_5] : memref<5x5x128xf32, #tpu.memory_space<vmem>>, vector<1x5x128xf32>
    %5 = vector.shape_cast %4 : vector<1x5x128xf32> to vector<5x128xf32>
    %c3 = arith.constant 3 : index
    %c0_6 = arith.constant 0 : index
    %c0_7 = arith.constant 0 : index
    %6 = vector.load %arg1[%c3, %c0_6, %c0_7] : memref<5x5x128xf32, #tpu.memory_space<vmem>>, vector<1x5x128xf32>
    %7 = vector.shape_cast %6 : vector<1x5x128xf32> to vector<5x128xf32>
    %c4 = arith.constant 4 : index
    %c0_8 = arith.constant 0 : index
    %c0_9 = arith.constant 0 : index
    %8 = vector.load %arg1[%c4, %c0_8, %c0_9] : memref<5x5x128xf32, #tpu.memory_space<vmem>>, vector<1x5x128xf32>
    %9 = vector.shape_cast %8 : vector<1x5x128xf32> to vector<5x128xf32>
    %c0_10 = arith.constant 0 : index
    %c0_11 = arith.constant 0 : index
    %10 = vector.load %arg2[%c0_10, %c0_11] : memref<18x128xf32, #tpu.memory_space<vmem>>, vector<1x128xf32>
    %11 = vector.broadcast %10 : vector<1x128xf32> to vector<5x128xf32>
    %12 = arith.mulf %11, %1 : vector<5x128xf32>
    %c1_12 = arith.constant 1 : index
    %c0_13 = arith.constant 0 : index
    %13 = vector.load %arg2[%c1_12, %c0_13] : memref<18x128xf32, #tpu.memory_space<vmem>>, vector<1x128xf32>
    %14 = vector.broadcast %13 : vector<1x128xf32> to vector<5x128xf32>
    %15 = arith.mulf %14, %3 : vector<5x128xf32>
    %16 = arith.addf %12, %15 : vector<5x128xf32>
    %c2_14 = arith.constant 2 : index
    %c0_15 = arith.constant 0 : index
    %17 = vector.load %arg2[%c2_14, %c0_15] : memref<18x128xf32, #tpu.memory_space<vmem>>, vector<1x128xf32>
    %18 = vector.broadcast %17 : vector<1x128xf32> to vector<5x128xf32>
    %19 = arith.mulf %18, %5 : vector<5x128xf32>
    %20 = arith.addf %16, %19 : vector<5x128xf32>
    %c9 = arith.constant 9 : index
    %c0_16 = arith.constant 0 : index
    %21 = vector.load %arg2[%c9, %c0_16] : memref<18x128xf32, #tpu.memory_space<vmem>>, vector<1x128xf32>
    %22 = vector.broadcast %21 : vector<1x128xf32> to vector<5x128xf32>
    %23 = arith.addf %20, %22 : vector<5x128xf32>
    %c3_17 = arith.constant 3 : index
    %c0_18 = arith.constant 0 : index
    %24 = vector.load %arg2[%c3_17, %c0_18] : memref<18x128xf32, #tpu.memory_space<vmem>>, vector<1x128xf32>
    %25 = vector.broadcast %24 : vector<1x128xf32> to vector<5x128xf32>
    %26 = arith.mulf %25, %1 : vector<5x128xf32>
    %c4_19 = arith.constant 4 : index
    %c0_20 = arith.constant 0 : index
    %27 = vector.load %arg2[%c4_19, %c0_20] : memref<18x128xf32, #tpu.memory_space<vmem>>, vector<1x128xf32>
    %28 = vector.broadcast %27 : vector<1x128xf32> to vector<5x128xf32>
    %29 = arith.mulf %28, %3 : vector<5x128xf32>
    %30 = arith.addf %26, %29 : vector<5x128xf32>
    %c5 = arith.constant 5 : index
    %c0_21 = arith.constant 0 : index
    %31 = vector.load %arg2[%c5, %c0_21] : memref<18x128xf32, #tpu.memory_space<vmem>>, vector<1x128xf32>
    %32 = vector.broadcast %31 : vector<1x128xf32> to vector<5x128xf32>
    %33 = arith.mulf %32, %5 : vector<5x128xf32>
    %34 = arith.addf %30, %33 : vector<5x128xf32>
    %c10 = arith.constant 10 : index
    %c0_22 = arith.constant 0 : index
    %35 = vector.load %arg2[%c10, %c0_22] : memref<18x128xf32, #tpu.memory_space<vmem>>, vector<1x128xf32>
    %36 = vector.broadcast %35 : vector<1x128xf32> to vector<5x128xf32>
    %37 = arith.addf %34, %36 : vector<5x128xf32>
    %c6 = arith.constant 6 : index
    %c0_23 = arith.constant 0 : index
    %38 = vector.load %arg2[%c6, %c0_23] : memref<18x128xf32, #tpu.memory_space<vmem>>, vector<1x128xf32>
    %39 = vector.broadcast %38 : vector<1x128xf32> to vector<5x128xf32>
    %40 = arith.mulf %39, %1 : vector<5x128xf32>
    %c7 = arith.constant 7 : index
    %c0_24 = arith.constant 0 : index
    %41 = vector.load %arg2[%c7, %c0_24] : memref<18x128xf32, #tpu.memory_space<vmem>>, vector<1x128xf32>
    %42 = vector.broadcast %41 : vector<1x128xf32> to vector<5x128xf32>
    %43 = arith.mulf %42, %3 : vector<5x128xf32>
    %44 = arith.addf %40, %43 : vector<5x128xf32>
    %c8 = arith.constant 8 : index
    %c0_25 = arith.constant 0 : index
    %45 = vector.load %arg2[%c8, %c0_25] : memref<18x128xf32, #tpu.memory_space<vmem>>, vector<1x128xf32>
    %46 = vector.broadcast %45 : vector<1x128xf32> to vector<5x128xf32>
    %47 = arith.mulf %46, %5 : vector<5x128xf32>
    %48 = arith.addf %44, %47 : vector<5x128xf32>
    %c11 = arith.constant 11 : index
    %c0_26 = arith.constant 0 : index
    %49 = vector.load %arg2[%c11, %c0_26] : memref<18x128xf32, #tpu.memory_space<vmem>>, vector<1x128xf32>
    %50 = vector.broadcast %49 : vector<1x128xf32> to vector<5x128xf32>
    %51 = arith.addf %48, %50 : vector<5x128xf32>
    %52 = tpu.reciprocal %51 {approx = true} : vector<5x128xf32> -> vector<5x128xf32>
    %53 = arith.mulf %51, %52 : vector<5x128xf32>
    %cst = arith.constant 2.000000e+00 : f32
    %54 = vector.broadcast %cst : f32 to vector<5x128xf32>
    %55 = arith.subf %54, %53 : vector<5x128xf32>
    %56 = arith.mulf %52, %55 : vector<5x128xf32>
    %57 = arith.mulf %23, %56 : vector<5x128xf32>
    %c12 = arith.constant 12 : index
    %c0_27 = arith.constant 0 : index
    %58 = vector.load %arg2[%c12, %c0_27] : memref<18x128xf32, #tpu.memory_space<vmem>>, vector<1x128xf32>
    %59 = vector.broadcast %58 : vector<1x128xf32> to vector<5x128xf32>
    %60 = arith.mulf %57, %59 : vector<5x128xf32>
    %c14 = arith.constant 14 : index
    %c0_28 = arith.constant 0 : index
    %61 = vector.load %arg2[%c14, %c0_28] : memref<18x128xf32, #tpu.memory_space<vmem>>, vector<1x128xf32>
    %62 = vector.broadcast %61 : vector<1x128xf32> to vector<5x128xf32>
    %63 = arith.addf %60, %62 : vector<5x128xf32>
    %64 = arith.mulf %37, %56 : vector<5x128xf32>
    %c13 = arith.constant 13 : index
    %c0_29 = arith.constant 0 : index
    %65 = vector.load %arg2[%c13, %c0_29] : memref<18x128xf32, #tpu.memory_space<vmem>>, vector<1x128xf32>
    %66 = vector.broadcast %65 : vector<1x128xf32> to vector<5x128xf32>
    %67 = arith.mulf %64, %66 : vector<5x128xf32>
    %c15 = arith.constant 15 : index
    %c0_30 = arith.constant 0 : index
    %68 = vector.load %arg2[%c15, %c0_30] : memref<18x128xf32, #tpu.memory_space<vmem>>, vector<1x128xf32>
    %69 = vector.broadcast %68 : vector<1x128xf32> to vector<5x128xf32>
    %70 = arith.addf %67, %69 : vector<5x128xf32>
    %71 = arith.subf %7, %63 : vector<5x128xf32>
    %72 = arith.subf %9, %70 : vector<5x128xf32>
    %73 = arith.mulf %71, %71 : vector<5x128xf32>
    %74 = arith.mulf %72, %72 : vector<5x128xf32>
    %75 = arith.addf %73, %74 : vector<5x128xf32>
    %cst_31 = arith.constant dense<0.000000e+00> : vector<128xf32>
    %76 = vector.multi_reduction <add>, %75, %cst_31 [0] : vector<5x128xf32> to vector<128xf32>
    %77 = vector.shape_cast %76 : vector<128xf32> to vector<1x128xf32>
    %c16 = arith.constant 16 : index
    %c0_32 = arith.constant 0 : index
    %78 = vector.load %arg2[%c16, %c0_32] : memref<18x128xf32, #tpu.memory_space<vmem>>, vector<1x128xf32>
    %c17 = arith.constant 17 : index
    %c0_33 = arith.constant 0 : index
    %79 = vector.load %arg2[%c17, %c0_33] : memref<18x128xf32, #tpu.memory_space<vmem>>, vector<1x128xf32>
    %80 = arith.mulf %77, %79 : vector<1x128xf32>
    %81 = arith.mulf %78, %78 : vector<1x128xf32>
    %82 = arith.addf %80, %81 : vector<1x128xf32>
    %c0_34 = arith.constant 0 : index
    %c0_35 = arith.constant 0 : index
    %83 = vector.load %arg3[%c0_34, %c0_35] : memref<1x128xf32, #tpu.memory_space<vmem>>, vector<1x128xf32>
    tpu.vector_store %arg3[%c0_34, %c0_35], %82 {strides = array<i32>} : memref<1x128xf32, #tpu.memory_space<vmem>>, vector<1x128xf32>,
    return
  }
  func.func @transform_0(%arg0: i32) -> (i32, i32, i32) {
    %c0_i32 = arith.constant 0 : i32
    %c0_i32_0 = arith.constant 0 : i32
    %c0_i32_1 = arith.constant 0 : i32
    return %c0_i32, %c0_i32_0, %arg0 : i32, i32, i32
  }
  func.func @transform_1(%arg0: i32) -> (i32, i32) {
    %c0_i32 = arith.constant 0 : i32
    %c0_i32_0 = arith.constant 0 : i32
    return %c0_i32, %arg0 : i32, i32
  }
  func.func @transform_2(%arg0: i32) -> (i32, i32) {
    %c0_i32 = arith.constant 0 : i32
    %c0_i32_0 = arith.constant 0 : i32
    return %c0_i32, %arg0 : i32, i32
  }
}

</mosaic_0001>

<bundles_post_ra>
// kernel: tpu_custom_call.1
= control target key start
LH: loop header
LB: loop body
LE: loop exit
PB: predicated region body
PF: predicated region fallthrough
CT: control target
= control target key end

     0   :  { %7 = vsyncpa [#allocation3], 0  ;;  %s310_s0 = inlined_call_operand.hbm [shape: f32[5,5,128], index: 0, kind: input, shape index: {}]   ;;  %s311_s1 = inlined_call_operand.hbm [shape: f32[18,128], index: 1, kind: input, shape index: {}]   ;;  %s312_s2 = inlined_call_operand.hbm [shape: f32[1,128], index: 2, kind: output, shape index: {}]  }
   0x1   :  { %8 = vsyncpa [#allocation6], 0 }
   0x2   :  { %9 = vsyncpa [#allocation4], 0  ;;  %s281_s9 = smov [#allocation2]  }
   0x3   :  { %s15_s10 = sshll.u32 %s281_s9, 4  ;;  %s16_s10 = int_to_ptr.vmem [resolvable:$true] %s15_s10 }
   0x4   :  { %s223_s11 = scalar_lea.vmem %s16_s10, 640  ;;  %p228_p1 = scmp.lt.s32.totalorder %s16_s10, %s16_s10 }
   0x5   :  { %p224_p0 = scmp.ne.s32.totalorder %s16_s10, %s223_s11  ;;  %p229_p2 = scmp.lt.s32.totalorder %s223_s11, %s223_s11 }
   0x7   :  { %p230_p3 = por %p229_p2, %p228_p1 }
   0x9   :  { %p231_p4 = pnand %p230_p3, %p224_p0 }
   0xb   :  { %234 = shalt.err (!%p231_p4)
}
   0xc   :  { %s282_s12 = smov 128   ;;  %s283_s13 = smov 8  }
   0xd   :  { %21 = dma.hbm_to_vmem [thread:$0]  %s310_s0, 640, %s16_s10, [#allocation3], %s282_s12, %s282_s12, %s283_s13  }
   0xe   :  { %s284_s16 = smov [#allocation5]  }
   0xf   :  { %s27_s17 = sshll.u32 %s284_s16, 4  ;;  %s28_s17 = int_to_ptr.vmem [resolvable:$true] %s27_s17 }
  0x10   :  { %s243_s18 = scalar_lea.vmem %s28_s17, 384  ;;  %p248_p6 = scmp.lt.s32.totalorder %s28_s17, %s28_s17 }
  0x11   :  { %p244_p5 = scmp.ne.s32.totalorder %s28_s17, %s243_s18  ;;  %p249_p7 = scmp.lt.s32.totalorder %s243_s18, %s243_s18 }
  0x13   :  { %p250_p8 = por %p249_p7, %p248_p6 }
  0x15   :  { %p251_p9 = pnand %p250_p8, %p244_p5 }
  0x17   :  { %254 = shalt.err (!%p251_p9)
}
  0x18   :  { %33 = dma.hbm_to_vmem [thread:$0]  %s311_s1, 384, %s28_s17, [#allocation6], %s282_s12, %s282_s12, %s283_s13  }
  0x19   :  { %275 = dma.done.wait [#allocation3], 640  }
  0x1a   :  { %276 = vsyncadd [#allocation3], 4294966656 }
  0x1b   :  { %277 = dma.done.wait [#allocation6], 384  }
  0x1c   :  { %278 = vsyncadd [#allocation6], 4294966912  ;;  %v40_v0 = vld [vmem:[#allocation2] sm:$0x1f]  ;;  %v42_v1 = vld [vmem:[#allocation2 + $0x8] sm:$0x1f] }
  0x1d   :  { %v44_v2 = vld [vmem:[#allocation2 + $0x10] sm:$0x1f]  ;;  %v200_v3 = vld [vmem:[#allocation5 + $0x6] ss:$0 sm:$0xff]  ;;  %v201_v4 = vld [vmem:[#allocation5 + $0x7] ss:$0 sm:$0xff] }
  0x1e   :  { %v106_v5 = vmul.f32 %v200_v3, %v40_v0  ;;  %v112_v6 = vmul.f32 %v201_v4, %v42_v1  ;;  %v202_v7 = vld [vmem:[#allocation5 + $0x8] ss:$0 sm:$0xff]  ;;  %v203_v10 = vld [vmem:[#allocation5 + $0xb] ss:$0 sm:$0xff]  ;;  %v192_v13 = vld [vmem:[#allocation5] ss:$0 sm:$0xff] }
  0x1f   :  { %v119_v8 = vmul.f32 %v202_v7, %v44_v2  ;;  %v193_v14 = vld [vmem:[#allocation5 + $0x1] ss:$0 sm:$0xff]  ;;  %v196_v15 = vld [vmem:[#allocation5 + $0x3] ss:$0 sm:$0xff]  ;;  %v197_v16 = vld [vmem:[#allocation5 + $0x4] ss:$0 sm:$0xff]  ;;  %v54_v17 = vmul.f32 %v192_v13, %v40_v0 }
  0x20   :  { %v113_v9 = vadd.f32 %v112_v6, %v106_v5  ;;  %v60_v18 = vmul.f32 %v193_v14, %v42_v1  ;;  %v80_v19 = vmul.f32 %v196_v15, %v40_v0  ;;  %v86_v20 = vmul.f32 %v197_v16, %v42_v1  ;;  %v194_v21 = vld [vmem:[#allocation5 + $0x2] ss:$0 sm:$0xff]  ;;  %v198_v22 = vld [vmem:[#allocation5 + $0x5] ss:$0 sm:$0xff]  ;;  %v195_v30 = vld [vmem:[#allocation5 + $0x9] ss:$0 sm:$0xff] }
  0x21   :  { %v67_v24 = vmul.f32 %v194_v21, %v44_v2  ;;  %v93_v26 = vmul.f32 %v198_v22, %v44_v2  ;;  %v199_v31 = vld [vmem:[#allocation5 + $0xa] ss:$0 sm:$0xff]  ;;  %v204_v37 = vld [vmem:[#allocation5 + $0xc] ss:$0 sm:$0xff]  ;;  %v206_v38 = vld [vmem:[#allocation5 + $0xd] ss:$0 sm:$0xff] }
  0x22   :  { %v120_v11 = vadd.f32 %v119_v8, %v113_v9  ;;  %v61_v23 = vadd.f32 %v60_v18, %v54_v17  ;;  %v87_v25 = vadd.f32 %v86_v20, %v80_v19  ;;  %v205_v41 = vld [vmem:[#allocation5 + $0xe] ss:$0 sm:$0xff]  ;;  %v207_v42 = vld [vmem:[#allocation5 + $0xf] ss:$0 sm:$0xff]  ;;  %v46_v45 = vld [vmem:[#allocation2 + $0x18] sm:$0x1f] }
  0x23   :  { %v48_v46 = vld [vmem:[#allocation2 + $0x20] sm:$0x1f]  ;;  %vm162_vm0 = vcmask 1044480   ;;  %v170_v59 = vld [vmem:[#allocation5 + $0x10] sm:$0x1]  ;;  %s285_s0 = smov [#allocation7]  }
  0x24   :  { %v126_v12 = vadd.f32 %v203_v10, %v120_v11  ;;  %v68_v27 = vadd.f32 %v67_v24, %v61_v23  ;;  %v94_v28 = vadd.f32 %v93_v26, %v87_v25  ;;  %v171_v61 = vld [vmem:[#allocation5 + $0x11] sm:$0x1]  ;;  %v173_v63 = vmul.f32 %v170_v59, %v170_v59  ;;  %s182_s1 = sshll.u32 %s285_s0, 4  ;;  %s183_s1 = int_to_ptr.vmem [resolvable:$true] %s182_s1 }
  0x25   :  { %s255_s21 = scalar_lea.vmem %s183_s1, 16  ;;  %s259_s22 = scalar_lea.vmem %s183_s1, 32 }
  0x26   :  { %213 = vrcp.f32 %v126_v12  ;;  %v74_v33 = vadd.f32 %v195_v30, %v68_v27  ;;  %v100_v34 = vadd.f32 %v199_v31, %v94_v28  ;;  %p256_p10 = scmp.ne.s32.totalorder %s183_s1, %s255_s21  ;;  %p260_p11 = scmp.lt.s32.totalorder %s183_s1, %s183_s1 }
  0x27   :  { %p261_p12 = scmp.lt.s32.totalorder %s259_s22, %s255_s21 }
  0x29   :  { %p262_p13 = por %p261_p12, %p260_p11 }
  0x2b   :  { %p263_p0 = pnand %p262_p13, %p256_p10 }
  0x33   :  { %v214_v29 = vpop.eup %213 }
  0x34   :  { %v128_v32 = vmul.f32 %v214_v29, %v126_v12 }
  0x36   :  { %v129_v35 = vsub.f32 2.0, %v128_v32 }
  0x38   :  { %v130_v36 = vmul.f32 %v214_v29, %v129_v35 }
  0x3a   :  { %v131_v39 = vmul.f32 %v130_v36, %v74_v33  ;;  %v144_v40 = vmul.f32 %v130_v36, %v100_v34 }
  0x3c   :  { %v137_v43 = vmul.f32 %v204_v37, %v131_v39  ;;  %v150_v44 = vmul.f32 %v206_v38, %v144_v40 }
  0x3e   :  { %v143_v47 = vadd.f32 %v205_v41, %v137_v43  ;;  %v156_v48 = vadd.f32 %v207_v42, %v150_v44 }
  0x40   :  { %v157_v49 = vsub.f32 %v46_v45, %v143_v47  ;;  %v158_v50 = vsub.f32 %v48_v46, %v156_v48 }
  0x42   :  { %v159_v51 = vmul.f32 %v157_v49, %v157_v49  ;;  %v160_v52 = vmul.f32 %v158_v50, %v158_v50 }
  0x44   :  { %v161_v53 = vadd.f32 %v160_v52, %v159_v51 }
  0x46   :  { %v163_v54 = vsel %vm162_vm0, %v161_v53, 0.0 }
  0x47   :  { %v164_v55 = vrot.slane %v163_v54, 4 }
  0x49   :  { %v165_v56 = vadd.f32 %v164_v55, %v163_v54 }
  0x4b   :  { %v166_v57 = vrot.slane %v165_v56, 2 }
  0x4d   :  { %v167_v58 = vadd.f32 %v166_v57, %v165_v56 }
  0x4f   :  { %v168_v60 = vrot.slane %v167_v58, 1 }
  0x51   :  { %v169_v62 = vadd.f32 %v168_v60, %v167_v58 }
  0x53   :  { %v172_v0 = vmul.f32 %v171_v61, %v169_v62 }
  0x55   :  { %v174_v1 = vadd.f32 %v173_v63, %v172_v0 }
  0x57   :  { %175 = vst [vmem:[#allocation7] sm:$0x1] %v174_v1 }
  0x58   :  { %266 = shalt.err (!%p263_p0)
}
  0x59   :  { %185 = dma.vmem_to_hbm [thread:$0]  %s183_s1, 16, %s312_s2, [#allocation4]  }
  0x5a   :  { %279 = dma.done.wait [#allocation4], 16  }
  0x5b   :  { %280 = vsyncadd [#allocation4], 4294967280 }
  0x5c   :  { %189 = vsyncpa [#allocation3], 1 }
  0x5d   :  { %190 = vsyncpa [#allocation6], 1 }
  0x5e   :  { %191 = vsyncpa [#allocation4], 1 }

</bundles_post_ra>
